<compile_context>
chip_gen: v5e
topology: v5e:2x2
jax: 0.10.0
libtpu: 0.0.40
codegen_flags: <defaults>
</compile_context>

<pallas_src>
import functools

import jax
import jax.numpy as jnp
from jax.experimental import pallas as pl
from jax.experimental.pallas import tpu as pltpu

_EPS = 1e-5          # torch nn.LayerNorm default
_WINDOW = 8          # SwinSpatialBlock window_size
_SHIFT = 4           # shift_size of the second SwinSpatialBlock


# ----------------------- pltpu.roll direction probe ------------------------ #

_ROLL_IS_NUMPY_LIKE = None


def _roll_is_numpy_like():
    """Probe (once) whether pltpu.roll matches np.roll (out[i] = x[i-shift])."""
    global _ROLL_IS_NUMPY_LIKE
    if _ROLL_IS_NUMPY_LIKE is None:
        n = 256

        def probe_kernel(x_ref, o_ref):
            o_ref[...] = pltpu.roll(x_ref[...], shift=1, axis=1)

        x = jnp.tile(jnp.arange(n, dtype=jnp.float32)[None, :], (8, 1))
        out = pl.pallas_call(
            probe_kernel,
            out_shape=jax.ShapeDtypeStruct((8, n), jnp.float32))(x)
        if bool(jnp.all(out == jnp.roll(x, 1, axis=1))):
            _ROLL_IS_NUMPY_LIKE = True
        elif bool(jnp.all(out == jnp.roll(x, -1, axis=1))):
            _ROLL_IS_NUMPY_LIKE = False
        else:
            raise RuntimeError("pltpu.roll probe returned unexpected semantics")
    return _ROLL_IS_NUMPY_LIKE


# ----------------------------- in-kernel math ------------------------------ #

def _erf(x):
    # Abramowitz & Stegun 7.1.26 (max abs err ~1.5e-7).
    p = 0.3275911
    a1, a2, a3, a4, a5 = (0.254829592, -0.284496736, 1.421413741,
                          -1.453152027, 1.061405429)
    ax = jnp.abs(x)
    t = 1.0 / (1.0 + p * ax)
    poly = ((((a5 * t + a4) * t + a3) * t + a2) * t + a1) * t
    y = 1.0 - poly * jnp.exp(-ax * ax)
    return jnp.where(x >= 0, y, -y)


def _gelu(x):
    # exact (erf-based) GELU, matching F.gelu defaults
    return 0.5 * x * (1.0 + _erf(x * 0.7071067811865475))


def _ln_channels(x, w, b):
    # LayerNorm over the channel (sublane) axis. x: [C, HW]; w, b: [C, 1].
    mu = jnp.mean(x, axis=0, keepdims=True)
    xc = x - mu
    var = jnp.mean(xc * xc, axis=0, keepdims=True)
    return xc * jax.lax.rsqrt(var + _EPS) * w + b


def _swin_block(x, P, lnc_w, lnc_b, lnhw_w, lnhw_b, w_proj, b_proj):
    """SwinSpatialBlock(x) + x on the [C, HW] layout.

    P: [HW, HW] window-averaging matrix (cyclic shift already folded in);
    lnhw_w / lnhw_b: [1, HW] position-in-window expanded LayerNorm(64) params.
    The window mean and E[y^2] are computed with a single stacked MXU pass.
    """
    C = x.shape[0]
    y = _ln_channels(x, lnc_w, lnc_b)                         # .norm (LN over C)
    if C % 8 == 0:
        stacked = jnp.concatenate([y, y * y], axis=0)         # [2C, HW]
        mom = jnp.dot(stacked, P, preferred_element_type=jnp.float32)
        m, ey2 = mom[:C], mom[C:]
    else:  # fallback (keeps sublane tiling clean for odd channel counts)
        m = jnp.dot(y, P, preferred_element_type=jnp.float32)
        ey2 = jnp.dot(y * y, P, preferred_element_type=jnp.float32)
    var = jnp.maximum(ey2 - m * m, 0.0)                       # E[(y-m)^2]
    yn = (y - m) * jax.lax.rsqrt(var + _EPS) * lnhw_w + lnhw_b
    out = jnp.dot(w_proj, yn, preferred_element_type=jnp.float32) + b_proj
    return out + x                                            # residual


def _lane_shift(x, k, hw, roll_np):
    """Return s with s[..., i] = x[..., (i + k) % hw] via an XLU roll."""
    if k % hw == 0:
        return x
    amt = (-k) % hw if roll_np else k % hw
    return pltpu.roll(x, shift=amt, axis=x.ndim - 1)


def _dwconv3x3(h, dw, m_top, m_bot, m_left, m_right, W, HW, roll_np):
    """Depthwise 3x3, stride 1, zero-pad 1, fully in-vreg on [Ch, HW].

    dw: [Ch, 9] with tap index ky*3 + kx.  Out-of-image taps are zeroed with
    multiplicative [1, HW] keep-masks (row masks fold exactly through the
    later horizontal roll because mismatches only occur at column-masked
    positions).  8 rolls + 8 mask muls per call; no VMEM scratch.
    """
    out = None
    for dy in (-1, 0, 1):
        xv = _lane_shift(h, dy * W, HW, roll_np)
        if dy == -1:
            xv = xv * m_top
        elif dy == 1:
            xv = xv * m_bot
        for dx in (-1, 0, 1):
            xt = _lane_shift(xv, dx, HW, roll_np)
            if dx == -1:
                xt = xt * m_left
            elif dx == 1:
                xt = xt * m_right
            t = (dy + 1) * 3 + (dx + 1)
            term = xt * dw[:, t:t + 1]
            out = term if out is None else out + term
    return out


def _ff_block(x, ln_w, ln_b, w_in, dw, w_out,
              m_top, m_bot, m_left, m_right, W, HW, roll_np):
    # PreNorm(LN over C) -> 1x1 C->4C -> GELU -> dw3x3 -> GELU -> 1x1 4C->C, + x
    yn = _ln_channels(x, ln_w, ln_b)
    h = _gelu(jnp.dot(w_in, yn, preferred_element_type=jnp.float32))
    h = _gelu(_dwconv3x3(h, dw, m_top, m_bot, m_left, m_right, W, HW, roll_np))
    out = jnp.dot(w_out, h, preferred_element_type=jnp.float32)
    return out + x


# --------------------------------- kernel ----------------------------------- #

def _fused_kernel(H, W, C, nb, roll_np,
                  x_ref, p0_ref, ps_ref, cvec_ref, hwvec_ref,
                  wproj_ref, win_ref, wout_ref, dwp_ref, o_ref):
    HW = H * W

    x = x_ref[0].astype(jnp.float32)          # [C, HW], lanes = flat spatial
    P0 = p0_ref[...]                          # [HW, HW]
    Ps = ps_ref[...]                          # [HW, HW]
    cv = cvec_ref[...]                        # [C, 8*nb]  packed per-channel vecs
    hv = hwvec_ref[...]                       # [4*nb, HW] packed per-position vecs

    # Hoisted multiplicative edge keep-masks (built once, reused every block).
    # Kept at [1, HW] (sublane-broadcast operand) on purpose: materializing
    # them at [4C, HW] would pin ~64 vregs and force spills.
    pos = jax.lax.broadcasted_iota(jnp.int32, (1, HW), 1)
    col = pos % W
    row = pos // W
    m_top = (row != 0).astype(jnp.float32)
    m_bot = (row != H - 1).astype(jnp.float32)
    m_left = (col != 0).astype(jnp.float32)
    m_right = (col != W - 1).astype(jnp.float32)

    for b in range(nb):                        # unrolled over blocks
        def cvv(j, _b=b):
            k = _b * 8 + j
            return cv[:, k:k + 1]              # [C, 1]

        def hwv(j, _b=b):
            r = _b * 4 + j
            return hv[r:r + 1, :]              # [1, HW]

        # x = attn1(x) + x   (window 8, shift 0)
        x = _swin_block(x, P0, cvv(0), cvv(1), hwv(0), hwv(1),
                        wproj_ref[2 * b], cvv(2))
        # x = attn2(x) + x   (window 8, shift 4; shift folded into Ps)
        x = _swin_block(x, Ps, cvv(3), cvv(4), hwv(2), hwv(3),
                        wproj_ref[2 * b + 1], cvv(5))
        # x = ff(x) + x
        x = _ff_block(x, cvv(6), cvv(7), win_ref[b], dwp_ref[b], wout_ref[b],
                      m_top, m_bot, m_left, m_right, W, HW, roll_np)

    o_ref[0] = x.astype(o_ref.dtype)


# --------------------------- host-side precompute ---------------------------- #

def _window_pool_and_pos(H, W, ws, shift):
    """Window-average matrix P [HW,HW] and position-in-window index [HW].

    Folds the cyclic shift: original position (h, w) lives at shifted
    coordinate ((h-shift)%H, (w-shift)%W); P[i, j] = 1/ws^2 iff i and j fall
    in the same ws x ws window of the shifted image.
    """
    h = (jnp.arange(H) - shift) % H
    w = (jnp.arange(W) - shift) % W
    win = (h[:, None] // ws) * (W // ws) + (w[None, :] // ws)     # [H, W]
    pos = (h[:, None] % ws) * ws + (w[None, :] % ws)              # [H, W]
    win = win.reshape(-1)
    pos = pos.reshape(-1)
    P = (win[:, None] == win[None, :]).astype(jnp.float32) / float(ws * ws)
    return P, pos


# ------------------------------ pallas wrapper ------------------------------- #

def spatial_ab_forward(x_nchw, params, window_size=_WINDOW, shift_size=_SHIFT):
    """x_nchw: [b, c, h, w] -> out: [b, c, h, w]  (matches SpatialAB.forward)."""
    B, C, H, W = x_nchw.shape
    HW = H * W
    assert H % window_size == 0 and W % window_size == 0
    nb = len(params)
    roll_np = _roll_is_numpy_like()

    P0, pos0 = _window_pool_and_pos(H, W, window_size, 0)
    Ps, poss = _window_pool_and_pos(H, W, window_size, shift_size)

    # NCHW already matches the [C, HW] kernel layout: pure reshape, no transpose.
    xf = x_nchw.reshape(B, C, HW)

    # Pack per-block params into 6 arrays (few DMAs, no [C,1] tile-pad waste).
    cvec_cols, hw_rows, wproj_l, win_l, wout_l, dw_l = [], [], [], [], [], []
    for blk in params:
        a1, a2, ff = blk["attn1"], blk["attn2"], blk["ff"]
        cvec_cols += [a1["ln_c_w"].reshape(-1), a1["ln_c_b"].reshape(-1),
                      a1["b_proj"].reshape(-1),
                      a2["ln_c_w"].reshape(-1), a2["ln_c_b"].reshape(-1),
                      a2["b_proj"].reshape(-1),
                      ff["ln_w"].reshape(-1), ff["ln_b"].reshape(-1)]
        hw_rows += [a1["ln_hw_w"][pos0], a1["ln_hw_b"][pos0],
                    a2["ln_hw_w"][poss], a2["ln_hw_b"][poss]]
        wproj_l += [a1["w_proj"], a2["w_proj"]]
        win_l.append(ff["w_in"])
        wout_l.append(ff["w_out"])
        dw_l.append(ff["dw"])

    cvec = jnp.stack(cvec_cols, axis=1).astype(jnp.float32)    # [C, 8*nb]
    hwvec = jnp.stack(hw_rows, axis=0).astype(jnp.float32)     # [4*nb, HW]
    wproj = jnp.stack(wproj_l, axis=0).astype(jnp.float32)     # [2*nb, C, C]
    win = jnp.stack(win_l, axis=0).astype(jnp.float32)         # [nb, 4C, C]
    wout = jnp.stack(wout_l, axis=0).astype(jnp.float32)       # [nb, C, 4C]
    dwp = jnp.stack(dw_l, axis=0).astype(jnp.float32)          # [nb, 4C, 9]

    def _const_spec(a):
        zeros = (0,) * a.ndim
        return pl.BlockSpec(a.shape, lambda b, _z=zeros: _z)

    consts = [P0, Ps, cvec, hwvec, wproj, win, wout, dwp]
    in_specs = [pl.BlockSpec((1, C, HW), lambda b: (b, 0, 0))]
    in_specs += [_const_spec(a) for a in consts]

    out = pl.pallas_call(
        functools.partial(_fused_kernel, H, W, C, nb, roll_np),
        out_shape=jax.ShapeDtypeStruct((B, C, HW), x_nchw.dtype),
        grid=(B,),
        in_specs=in_specs,
        out_specs=pl.BlockSpec((1, C, HW), lambda b: (b, 0, 0)),
        compiler_params=pltpu.CompilerParams(
            dimension_semantics=("parallel",)),
    )(xf, *consts)

    return out.reshape(B, C, H, W)


# ------------------------------ param creation ------------------------------- #

def init_params(key, dim, num_blocks, window_size=_WINDOW):
    """Deterministic synthetic parameters with the reference module's shapes.

    Per block: attn1/attn2 = {LayerNorm(dim) [C]x2, LayerNorm(ws^2) [64]x2,
    proj Linear [C,C] + bias [C]}, ff = {LayerNorm(dim) [C]x2, 1x1 conv [4C,C],
    depthwise 3x3 [4C,9] (index ky*3+kx), 1x1 conv [C,4C]}.
    (SpatialMLP.mapping / .emb and DropPath exist in the torch module but are
    never used in forward, so they carry no parameters here.)
    """
    ws2 = window_size * window_size
    hidden = 4 * dim
    blocks = []
    for b in range(num_blocks):
        kb = jax.random.fold_in(key, b)

        def r(i, shape, fan_in):
            return (jax.random.normal(jax.random.fold_in(kb, i), shape,
                                      jnp.float32) / float(fan_in) ** 0.5)

        def attn(i0):
            return dict(
                ln_c_w=jnp.ones((dim,), jnp.float32),
                ln_c_b=jnp.zeros((dim,), jnp.float32),
                ln_hw_w=1.0 + 0.02 * r(i0 + 0, (ws2,), 1),
                ln_hw_b=0.02 * r(i0 + 1, (ws2,), 1),
                w_proj=r(i0 + 2, (dim, dim), dim),
                b_proj=0.01 * r(i0 + 3, (dim,), 1),
            )

        ff = dict(
            ln_w=jnp.ones((dim,), jnp.float32),
            ln_b=jnp.zeros((dim,), jnp.float32),
            w_in=r(20, (hidden, dim), dim),
            dw=r(21, (hidden, 9), 9),
            w_out=r(22, (dim, hidden), hidden),
        )
        blocks.append(dict(attn1=attn(0), attn2=attn(10), ff=ff))
    return blocks


# --------------------------- pure-JAX reference ------------------------------ #

def _reference_forward(x_nchw, params, window_size=_WINDOW, shift_size=_SHIFT):
    """Direct (non-Pallas) port of SpatialAB.forward, for correctness checks."""
    B, C, H, W = x_nchw.shape
    ws = window_size
    x = jnp.transpose(x_nchw, (0, 2, 3, 1)).astype(jnp.float32)   # [B,H,W,C]

    def ln(v, w, b):
        mu = jnp.mean(v, axis=-1, keepdims=True)
        var = jnp.mean((v - mu) ** 2, axis=-1, keepdims=True)
        return (v - mu) * jax.lax.rsqrt(var + _EPS) * w + b

    def swin(v, p, shift):
        y = ln(v, p["ln_c_w"], p["ln_c_b"])                       # LN over C
        if shift:
            y = jnp.roll(y, (-shift, -shift), axis=(1, 2))
        y = y.reshape(B, H // ws, ws, W // ws, ws, C)
        y = y.transpose(0, 1, 3, 2, 4, 5).reshape(-1, ws * ws, C)  # windows
        yt = jnp.transpose(y, (0, 2, 1))                           # [nW*B,C,64]
        yt = ln(yt, p["ln_hw_w"], p["ln_hw_b"])                    # LN over 64
        y = jnp.transpose(yt, (0, 2, 1))
        y = jnp.einsum("nwc,oc->nwo", y, p["w_proj"]) + p["b_proj"]
        y = y.reshape(B, H // ws, W // ws, ws, ws, C)
        y = y.transpose(0, 1, 3, 2, 4, 5).reshape(B, H, W, C)      # reverse
        if shift:
            y = jnp.roll(y, (shift, shift), axis=(1, 2))
        return y

    def ff(v, p):
        y = ln(v, p["ln_w"], p["ln_b"])
        y = jnp.transpose(y, (0, 3, 1, 2))                         # NCHW
        y = jnp.einsum("oc,bchw->bohw", p["w_in"], y)
        y = jax.nn.gelu(y, approximate=False)
        wdw = p["dw"].reshape(-1, 1, 3, 3)
        y = jax.lax.conv_general_dilated(
            y, wdw, window_strides=(1, 1), padding="SAME",
            feature_group_count=y.shape[1],
            dimension_numbers=("NCHW", "OIHW", "NCHW"))
        y = jax.nn.gelu(y, approximate=False)
        y = jnp.einsum("oc,bchw->bohw", p["w_out"], y)
        return jnp.transpose(y, (0, 2, 3, 1))

    for blk in params:
        x = swin(x, blk["attn1"], 0) + x
        x = swin(x, blk["attn2"], shift_size) + x
        x = ff(x, blk["ff"]) + x
    return jnp.transpose(x, (0, 3, 1, 2))


# ----------------------------------- main ------------------------------------ #

if __name__ == "__main__":
    # SpatialAB(stage, dim=16, num_blocks=2) at a small spatial size (H=W=16,
    # divisible by window_size=8).
    dim, num_blocks = 16, 2
    B, H, W = 2, 16, 16

    key = jax.random.PRNGKey(0)
    kx, kp = jax.random.split(key)
    x = jax.random.normal(kx, (B, dim, H, W), dtype=jnp.float32)   # [b, c, h, w]
    params = init_params(kp, dim, num_blocks)

    out = jax.block_until_ready(spatial_ab_forward(x, params))
    assert out.shape == (B, dim, H, W), out.shape
    assert bool(jnp.all(jnp.isfinite(out)))

    # Independent pure-JAX reference (direct PyTorch-forward port).
    ref = jax.block_until_ready(_reference_forward(x, params))
    err = float(jnp.max(jnp.abs(out - ref)) / (jnp.max(jnp.abs(ref)) + 1e-6))
    assert err < 5e-3, f"kernel/reference mismatch, normalized max err={err}"

    print("KERNEL_OK")
</pallas_src>

<mosaic_0001>
module attributes {stable_mosaic.version = 11 : i64} {
  func.func @probe_kernel(%arg0: memref<8x256xf32, #tpu.memory_space<vmem>>, %arg1: memref<8x256xf32, #tpu.memory_space<vmem>>) attributes {dimension_semantics = [], scalar_prefetch = 0 : i64, scratch_operands = 0 : i64, tpu.core_type = #tpu.core_type<tc>} {
    %c0 = arith.constant 0 : index
    %c0_0 = arith.constant 0 : index
    %0 = vector.load %arg0[%c0, %c0_0] : memref<8x256xf32, #tpu.memory_space<vmem>>, vector<8x256xf32>
    %c1_i32 = arith.constant 1 : i32
    %1 = tpu.dynamic_rotate %0 by %c1_i32 dim 1 : vector<8x256xf32>, i32 -> vector<8x256xf32>
    %c0_1 = arith.constant 0 : index
    %c0_2 = arith.constant 0 : index
    %2 = vector.load %arg1[%c0_1, %c0_2] : memref<8x256xf32, #tpu.memory_space<vmem>>, vector<8x256xf32>
    tpu.vector_store %arg1[%c0_1, %c0_2], %1 {strides = array<i32>} : memref<8x256xf32, #tpu.memory_space<vmem>>, vector<8x256xf32>,
    return
  }
}

</mosaic_0001>

<bundles_post_ra>
// kernel: tpu_custom_call.1
= control target key start
LH: loop header
LB: loop body
LE: loop exit
PB: predicated region body
PF: predicated region fallthrough
CT: control target
= control target key end

     0   :  { %6 = vsyncpa [#allocation3], 0  ;;  %s127_s0 = inlined_call_operand.hbm [shape: f32[8,256], index: 0, kind: input, shape index: {}]   ;;  %s128_s1 = inlined_call_operand.hbm [shape: f32[8,256], index: 1, kind: output, shape index: {}]  }
   0x1   :  { %7 = vsyncpa [#allocation4], 0  ;;  %s13_s8 = sshll.u32 %s127_s0, 4  ;;  %s108_s9 = smov [#allocation2]   ;;  %s14_s8 = int_to_ptr.hbm [resolvable:$true] %s13_s8 }
   0x2   :  { %s15_s10 = sshll.u32 %s108_s9, 4  ;;  %s16_s10 = int_to_ptr.vmem [resolvable:$true] %s15_s10 }
   0x3   :  { %18 = dma.hbm_to_vmem [thread:$0]  %s14_s8, 256, %s16_s10, [#allocation3]  }
   0x4   :  { %104 = dma.done.wait [#allocation3], 256  }
   0x5   :  { %105 = vsyncadd [#allocation3], 4294967040  ;;  %v23_v0 = vld [vmem:[#allocation2] sm:$0xff]  ;;  %s109_s11 = smov 1   ;;  %v24_v1 = vld [vmem:[#allocation2 + $0x8] sm:$0xff]  ;;  %v29_v2 = vlaneseq  ;;  %s110_s12 = smov [#allocation5]  }
   0x6   :  { %25 = vrot.lane.b32.xlu0 %v23_v0, %s109_s11  ;;  %s41_s13 = sshll.u32 %s110_s12, 4  ;;  %s43_s15 = sshll.u32 %s128_s1, 4  ;;  %s42_s13 = int_to_ptr.vmem [resolvable:$true] %s41_s13  ;;  %s44_s15 = int_to_ptr.hbm [resolvable:$true] %s43_s15 }
   0x7   :  { %v30_v4 = vand.u32 127, %v29_v2 }
   0x9   :  { %vm31_vm0 = vcmp.lt.s32.totalorder %v30_v4, 1 }
   0xe   :  { %27 = vrot.lane.b32.xlu0 %v24_v1, %s109_s11 }
  0x78   :  { %v26_v3 = vpop.permute.xlu0 %25 }
  0x80   :  { %v28_v5 = vpop.permute.xlu0 %27 }
  0x81   :  { %v32_v6 = vsel %vm31_vm0, %v26_v3, %v28_v5  ;;  %v33_v7 = vsel %vm31_vm0, %v28_v5, %v26_v3 }
  0x82   :  { %34 = vst [vmem:[#allocation5] sm:$0xff] %v33_v7 }
  0x83   :  { %35 = vst [vmem:[#allocation5 + $0x8] sm:$0xff] %v32_v6 }
  0x84   :  { %46 = dma.vmem_to_hbm [thread:$0]  %s42_s13, 256, %s44_s15, [#allocation4]  }
  0x85   :  { %106 = dma.done.wait [#allocation4], 256  }
  0x86   :  { %107 = vsyncadd [#allocation4], 4294967040 }
  0x87   :  { %51 = vsyncpa [#allocation3], 1 }
  0x88   :  { %52 = vsyncpa [#allocation4], 1 }

</bundles_post_ra>
